<compile_context>
chip_gen: v7x
topology: tpu7x:2x2x1
jax: 0.10.0
libtpu: 0.0.40
codegen_flags: <defaults>
</compile_context>

<pallas_src>
import functools

import jax
import jax.numpy as jnp
from jax.experimental import pallas as pl
from jax.experimental.pallas import tpu as pltpu


# ----------------------------------------------------------------------------- config / utils
POOL_VMEM_BUDGET = 8 * 1024 * 1024
NORM_VMEM_BUDGET = 4 * 1024 * 1024


def parse_str_to_list(s, sep=','):
    return [x.replace(' ', '') for x in s.split(sep)]


# torchvision VGG feature configs ('E' = vgg19, 'D' = vgg16)
VGG19_CFG = [64, 64, 'M', 128, 128, 'M', 256, 256, 256, 256, 'M',
             512, 512, 512, 512, 'M', 512, 512, 512, 512, 'M']
VGG16_CFG = [64, 64, 'M', 128, 128, 'M', 256, 256, 256, 'M',
             512, 512, 512, 'M', 512, 512, 512, 'M']


def build_vgg_blocks(cfg, block_end_idxs):
    """List-of-blocks of ('conv',(cin,cout)) / ('relu',None) / ('pool',None), split at the given
    torchvision `features` indices (inclusive).  Layers past the last boundary are dropped
    (same as the PyTorch module)."""
    layers = []
    in_c = 3
    for v in cfg:
        if v == 'M':
            layers.append(('pool', None))   # MaxPool replaced by AvgPool2d(2) (ext_pooling='avgpool')
        else:
            layers.append(('conv', (in_c, v)))
            layers.append(('relu', None))
            in_c = v
    blocks, cur = [], []
    for i, layer in enumerate(layers):
        cur.append(layer)
        if i in block_end_idxs:
            blocks.append(cur)
            cur = []
    return blocks


def fuse_block(block):
    """Fuse conv+relu(+pool) runs.  Returns ops:
       ['conv', cin, cout, pool_after(bool), out_f32(bool)]  or  ['pool']."""
    ops, i = [], 0
    while i < len(block):
        kind, arg = block[i]
        if kind == 'conv':
            j = i + 1
            if j < len(block) and block[j][0] == 'relu':   # every conv in these cfgs has a ReLU
                j += 1
            pool_after = j < len(block) and block[j][0] == 'pool'
            ops.append(['conv', arg[0], arg[1], pool_after, False])
            i = j + (1 if pool_after else 0)
        elif kind == 'pool':
            ops.append(['pool'])
            i += 1
        else:
            i += 1
    if ops and ops[-1][0] == 'conv':
        ops[-1][4] = True          # block output is exposed as a feature -> keep it in f32
    return ops


# ----------------------------------------------------------------------------- VMEM sizing
@functools.lru_cache(maxsize=None)
def _vmem_params():
    """(vmem_limit_bytes, conv working-set budget) sized per TPU generation."""
    try:
        cap = int(pltpu.get_tpu_info().vmem_capacity_bytes)
    except Exception:
        cap = 0
    if cap <= 0:
        cap = 64 * 1024 * 1024                       # conservative default (v7x per-core VMEM)
    limit = max(32 << 20, min((cap * 3) // 4, 100 << 20))   # ~96 MiB on 128-MiB chips, ~48 on v7x
    budget = max(16 << 20, min((cap * 2) // 5, 64 << 20))   # ~51 MiB / ~25 MiB working set
    return limit, budget


# ----------------------------------------------------------------------------- halo-window probe
_HALO_OK = None


def _probe_halo_blockspec():
    """Check (once, eagerly) that overlapping row windows via pl.Element lower and are correct."""
    try:
        TH, W, C = 8, 8, 128
        H = 2 * TH
        x = jnp.arange((H + 2) * W * C, dtype=jnp.float32).reshape(1, H + 2, W, C)

        def k(x_ref, o_ref):
            o_ref[0] = x_ref[0, 1:TH + 1]

        f = pl.pallas_call(
            k,
            out_shape=jax.ShapeDtypeStruct((1, H, W, C), jnp.float32),
            grid=(1, H // TH),
            in_specs=[pl.BlockSpec((1, pl.Element(TH + 2), W, C),
                                   lambda n, i: (n, i * TH, 0, 0))],
            out_specs=pl.BlockSpec((1, TH, W, C), lambda n, i: (n, i, 0, 0)),
        )
        y = jax.block_until_ready(f(x))
        return bool(jnp.array_equal(y, x[:, 1:H + 1]))
    except Exception:
        return False


def _resolve_halo_support():
    global _HALO_OK
    if _HALO_OK is None:
        _HALO_OK = _probe_halo_blockspec()
    return _HALO_OK


# ----------------------------------------------------------------------------- tile choosers
def _pick_conv_rows(H, W, Cin, Cout, out_bytes, pooled, budget):
    """Largest row-tile TH dividing H (even if pooled) whose estimated working set fits."""
    Wp = W + 2

    def cost(th):
        inp = 2 * (th + 2) * Wp * Cin * 2                 # halo tile, double-buffered, bf16
        wgt = 2 * 3 * (3 * Cin) * Cout * 2                # weights, double-buffered, bf16
        orows = th // 2 if pooled else th
        outb = 2 * orows * W * Cout * out_bytes           # output block, double-buffered
        scr = (th + 2) * W * 3 * Cin * 2 + 2 * th * W * Cout * 4   # colcat + f32 acc in-kernel
        return inp + wgt + outb + scr

    divs = [d for d in range(H, 0, -1) if H % d == 0 and (not pooled or d % 2 == 0)]
    if not divs:
        return H
    for d in divs:
        if cost(d) <= budget:
            return d
    return divs[-1]


def _pick_pool_rows(H, per_row_bytes, budget):
    for d in range(H, 0, -1):
        if H % d == 0 and d * per_row_bytes <= budget:
            return d
    return 1


def _pick_norm_rows(H, L, budget=NORM_VMEM_BUDGET):
    cands = [d for d in range(H, 0, -1)
             if H % d == 0 and (d % 8 == 0 or d == H)]   # (TH, L) are the tiled dims
    for d in cands:
        if 6 * d * L * 4 <= budget:
            return d
    return cands[-1]


# ----------------------------------------------------------------------------- normalize kernel
def _normalize_kernel(x_ref, m_ref, s_ref, o_ref):
    # lane-dense (1, TH, W*C); multiply by the precomputed reciprocal of std (no division).
    o_ref[...] = ((x_ref[...] - m_ref[...]) * s_ref[...]).astype(o_ref.dtype)


@jax.jit
def normalize(x_nhwc, mean, inv_std):
    """Caffe-style (x - mean) * (1/std).  x: (N,H,W,C) f32 -> (N,H,W,C) bf16."""
    N, H, W, C = x_nhwc.shape
    L = W * C
    x3 = x_nhwc.reshape(N, H, L)                       # metadata-only reshape, lane-dense last dim
    m = jnp.tile(mean.reshape(-1), W).reshape(1, 1, L)
    s = jnp.tile(inv_std.reshape(-1), W).reshape(1, 1, L)
    TH = _pick_norm_rows(H, L)
    vmem_limit, _ = _vmem_params()
    x_spec = pl.BlockSpec((1, TH, L), lambda n, i: (n, i, 0))
    p_spec = pl.BlockSpec((1, 1, L), lambda n, i: (0, 0, 0))
    y = pl.pallas_call(
        _normalize_kernel,
        out_shape=jax.ShapeDtypeStruct((N, H, L), jnp.bfloat16),
        grid=(N, H // TH),
        in_specs=[x_spec, p_spec, p_spec],
        out_specs=x_spec,
        compiler_params=pltpu.CompilerParams(
            dimension_semantics=("parallel", "parallel"),
            vmem_limit_bytes=vmem_limit),
    )(x3, m, s)
    return y.reshape(N, H, W, C)


# ----------------------------------------------------------------------------- conv3x3 + bias + ReLU (+ row-pool)
def _conv_core(xt, w_ref, b_ref, o_ref, pool_rows):
    # xt:    (TH+2, Wp, Cin) bf16 halo'd padded tile (a value)
    # w_ref: (3, 3*Cin, TCo)  bf16, VMEM-resident     b_ref: (1, TCo) f32
    # o_ref: (1, TH or TH//2, W, TCo)
    THp2, Wp, Cin = xt.shape
    TH, W = THp2 - 2, Wp - 2
    TCo = o_ref.shape[3]

    acc = None
    if 3 * Cin >= 128:
        # one dx-concat of the tile, then 3 MXU matmuls with K = 3*Cin (loop over dy only).
        colcat = jnp.concatenate([xt[:, 0:W], xt[:, 1:W + 1], xt[:, 2:W + 2]], axis=-1)
        for dy in range(3):
            lhs = colcat[dy:dy + TH].reshape(TH * W, 3 * Cin)
            part = jnp.dot(lhs, w_ref[dy], preferred_element_type=jnp.float32)
            acc = part if acc is None else acc + part
    else:
        # tiny-Cin first layer: keep the simple 9-matmul path (negligible FLOPs).
        for dy in range(3):
            for dx in range(3):
                lhs = xt[dy:dy + TH, dx:dx + W, :].reshape(TH * W, Cin)
                part = jnp.dot(lhs, w_ref[dy, dx * Cin:(dx + 1) * Cin, :],
                               preferred_element_type=jnp.float32)
                acc = part if acc is None else acc + part

    y = jnp.maximum(acc + b_ref[...], 0.0)             # fused bias + ReLU, f32 (TH*W, TCo)
    if pool_rows:
        y4 = y.reshape(TH // 2, 2, W, TCo)             # leading-dim split: free
        y = (y4[:, 0] + y4[:, 1]) * 0.5                # H-half of the following AvgPool2d(2)
        o_ref[0] = y.astype(o_ref.dtype)
    else:
        o_ref[0] = y.reshape(TH, W, TCo).astype(o_ref.dtype)


def _conv_kernel_halo(xt_ref, w_ref, b_ref, o_ref, *, pool_rows):
    _conv_core(xt_ref[0], w_ref, b_ref, o_ref, pool_rows)


def _conv_kernel_split(xb_ref, h1_ref, h2_ref, w_ref, b_ref, o_ref, *, pool_rows):
    xt = jnp.concatenate([xb_ref[0], h1_ref[0], h2_ref[0]], axis=0)
    _conv_core(xt, w_ref, b_ref, o_ref, pool_rows)


@functools.partial(jax.jit, static_argnames=("pool_rows", "out_f32"))
def conv3x3_relu(x, w, b, *, pool_rows=False, out_f32=False):
    """3x3 'same' conv (stride 1, pad 1) + bias + ReLU, NHWC.
    If pool_rows: additionally averages adjacent output-row pairs (H-half of AvgPool2d(2)).
    x: (N,H,W,Cin) f32/bf16, w: (3,3,Cin,Cout) f32, b: (Cout,) f32."""
    N, H, W, Cin = x.shape
    Cout = w.shape[-1]
    Wp = W + 2
    out_dtype = jnp.float32 if out_f32 else jnp.bfloat16
    out_bytes = 4 if out_f32 else 2
    vmem_limit, conv_budget = _vmem_params()

    xp = jnp.pad(x.astype(jnp.bfloat16), ((0, 0), (1, 1), (1, 1), (0, 0)))   # bf16 padded copy
    w3 = w.reshape(3, 3 * Cin, Cout).astype(jnp.bfloat16)                    # (dy, dx*Cin+ci, co)
    b2 = b.reshape(1, Cout).astype(jnp.float32)

    TH = _pick_conv_rows(H, W, Cin, Cout, out_bytes, pool_rows, conv_budget)
    nH = H // TH
    # keep both v7x TensorCores busy on deep layers when (N, nH) degenerates to one step.
    nCo = 2 if (N * nH < 2 and Cout % 256 == 0) else 1
    TCo = Cout // nCo
    out_rows = TH // 2 if pool_rows else TH
    Hout = H // 2 if pool_rows else H

    w_spec = pl.BlockSpec((3, 3 * Cin, TCo), lambda n, i, j: (0, 0, j))   # VMEM-resident weights
    b_spec = pl.BlockSpec((1, TCo), lambda n, i, j: (0, j))
    out_spec = pl.BlockSpec((1, out_rows, W, TCo), lambda n, i, j: (n, i, 0, j))

    halo_kernel = functools.partial(_conv_kernel_halo, pool_rows=pool_rows)
    if nH == 1:
        # whole padded image fits the budget: single Blocked halo tile, no overlap machinery.
        in_specs = [pl.BlockSpec((1, H + 2, Wp, Cin), lambda n, i, j: (n, 0, 0, 0)),
                    w_spec, b_spec]
        kernel, operands = halo_kernel, (xp, w3, b2)
    elif _HALO_OK:
        # overlapping (TH+2)-row windows: one DMA per tile via element-offset row indexing.
        in_specs = [pl.BlockSpec((1, pl.Element(TH + 2), Wp, Cin),
                                 lambda n, i, j: (n, i * TH, 0, 0)),
                    w_spec, b_spec]
        kernel, operands = halo_kernel, (xp, w3, b2)
    else:
        # fallback: body block + two 1-row halo blocks, stitched in-kernel.
        in_specs = [pl.BlockSpec((1, TH, Wp, Cin), lambda n, i, j: (n, i, 0, 0)),
                    pl.BlockSpec((1, 1, Wp, Cin), lambda n, i, j: (n, (i + 1) * TH, 0, 0)),
                    pl.BlockSpec((1, 1, Wp, Cin), lambda n, i, j: (n, (i + 1) * TH + 1, 0, 0)),
                    w_spec, b_spec]
        kernel = functools.partial(_conv_kernel_split, pool_rows=pool_rows)
        operands = (xp, xp, xp, w3, b2)

    return pl.pallas_call(
        kernel,
        out_shape=jax.ShapeDtypeStruct((N, Hout, W, Cout), out_dtype),
        grid=(N, nH, nCo),
        in_specs=in_specs,
        out_specs=out_spec,
        compiler_params=pltpu.CompilerParams(
            dimension_semantics=("parallel", "parallel", "parallel"),
            vmem_limit_bytes=vmem_limit),
    )(*operands)


# ----------------------------------------------------------------------------- pooling kernels
def _wpool2_kernel(x_ref, o_ref):
    # x_ref: (1, TH, Wo, 2C); lanes hold [even-column channels | odd-column channels].
    C = o_ref.shape[3]
    xb = x_ref[0].astype(jnp.float32)
    o_ref[0] = ((xb[..., :C] + xb[..., C:]) * 0.5).astype(o_ref.dtype)


@jax.jit
def wpool2(x):
    """Average adjacent column pairs (W-half of AvgPool2d(2)); rows were pooled in the conv."""
    N, H, W, C = x.shape
    Wo = W // 2
    xv = x.reshape(N, H, Wo, 2 * C)                      # metadata-only reshape
    TH = _pick_pool_rows(H, 24 * Wo * C, POOL_VMEM_BUDGET)
    vmem_limit, _ = _vmem_params()
    in_spec = pl.BlockSpec((1, TH, Wo, 2 * C), lambda n, i: (n, i, 0, 0))
    out_spec = pl.BlockSpec((1, TH, Wo, C), lambda n, i: (n, i, 0, 0))
    return pl.pallas_call(
        _wpool2_kernel,
        out_shape=jax.ShapeDtypeStruct((N, H, Wo, C), x.dtype),
        grid=(N, H // TH),
        in_specs=[in_spec],
        out_specs=out_spec,
        compiler_params=pltpu.CompilerParams(
            dimension_semantics=("parallel", "parallel"),
            vmem_limit_bytes=vmem_limit),
    )(xv)


def _avgpool2_kernel(x_ref, o_ref):
    # x_ref: (1, THo, 2, Wo, 2C); full 2x2 average pool (fallback when not fused into the conv).
    C = o_ref.shape[3]
    xb = x_ref[0].astype(jnp.float32)
    s = xb[:, 0] + xb[:, 1]
    o_ref[0] = ((s[:, :, :C] + s[:, :, C:]) * 0.25).astype(o_ref.dtype)


@jax.jit
def avgpool2(x):
    """AvgPool2d(kernel=2, stride=2), NHWC; floor behaviour for odd H/W like PyTorch."""
    N, H, W, C = x.shape
    Ho, Wo = H // 2, W // 2
    x = x[:, :Ho * 2, :Wo * 2, :]
    xv = x.reshape(N, Ho, 2, Wo, 2 * C)                  # metadata-only reshape
    THo = _pick_pool_rows(Ho, 48 * Wo * C, POOL_VMEM_BUDGET)
    vmem_limit, _ = _vmem_params()
    in_spec = pl.BlockSpec((1, THo, 2, Wo, 2 * C), lambda n, i: (n, i, 0, 0, 0))
    out_spec = pl.BlockSpec((1, THo, Wo, C), lambda n, i: (n, i, 0, 0))
    return pl.pallas_call(
        _avgpool2_kernel,
        out_shape=jax.ShapeDtypeStruct((N, Ho, Wo, C), x.dtype),
        grid=(N, Ho // THo),
        in_specs=[in_spec],
        out_specs=out_spec,
        compiler_params=pltpu.CompilerParams(
            dimension_semantics=("parallel", "parallel"),
            vmem_limit_bytes=vmem_limit),
    )(xv)


# ----------------------------------------------------------------------------- the wrapper
class NetworkWrapperPallas:
    """JAX/Pallas port of V2/models/extractor.NetworkWrapper with the default args:
       ext_full_net_names='vgg19_imagenet_caffe, vgg16_face_caffe'
       ext_net_layers='1,6,11,20,29; 1,6,11,18,25'
       ext_pooling='avgpool', ext_prefixes='real, fake'."""

    def __init__(self, key):
        _resolve_halo_support()
        self.prefixes = parse_str_to_list('real, fake')
        self.full_net_names = parse_str_to_list('vgg19_imagenet_caffe, vgg16_face_caffe')
        net_layer_strs = parse_str_to_list('1,6,11,20,29; 1,6,11,18,25', sep=';')
        cfgs = {'vgg19': VGG19_CFG, 'vgg16': VGG16_CFG}

        self.nets = []     # list of (fused_blocks, params)
        self.norms = {}    # full_net_name -> (mean, inv_std) shaped (3,)
        for full_net_name, idx_str in zip(self.full_net_names, net_layer_strs):
            net_name, dataset_name, framework_name = full_net_name.split('_')
            # both default nets are 'caffe' framework -> caffe normalization constants.
            mean = jnp.array([103.939, 116.779, 123.68], jnp.float32) / 127.5 - 1.0
            std = jnp.array([1.0, 1.0, 1.0], jnp.float32) / 127.5
            self.norms[full_net_name] = (mean, 1.0 / std)

            block_idx = set(int(s) for s in parse_str_to_list(idx_str))
            blocks = build_vgg_blocks(cfgs[net_name], block_idx)

            fused_blocks, params = [], []
            for block in blocks:
                ops = fuse_block(block)
                fused_blocks.append(ops)
                for op in ops:
                    if op[0] == 'conv':
                        cin, cout = op[1], op[2]
                        key, kw_, kb_ = jax.random.split(key, 3)
                        wstd = (2.0 / (9.0 * cin)) ** 0.5
                        w = jax.random.normal(kw_, (3, 3, cin, cout), jnp.float32) * wstd
                        bb = jax.random.normal(kb_, (cout,), jnp.float32) * 0.01
                        params.append((w, bb))
            self.nets.append((fused_blocks, params))

    @staticmethod
    def _run_block(x, ops, param_iter):
        for op in ops:
            if op[0] == 'conv':
                _, cin, cout, pool_after, out_f32 = op
                w, b = next(param_iter)
                N, H, W, _ = x.shape
                fuse_pool = pool_after and (H % 2 == 0) and (W % 2 == 0)
                x = conv3x3_relu(x, w, b, pool_rows=fuse_pool, out_f32=out_f32)
                if pool_after:
                    x = wpool2(x) if fuse_pool else avgpool2(x)
            else:                      # standalone pool (does not occur for the default cfgs)
                x = avgpool2(x)
        return x

    def forward(self, inputs):
        _resolve_halo_support()
        data_dict, _aliases_to_train = inputs
        data_dict = dict(data_dict)
        for prefix in self.prefixes:
            imgs = data_dict[f'{prefix}_imgs']          # (b, t, c, h, w) like PyTorch
            b, t, c, h, w = imgs.shape
            imgs = imgs.reshape(b * t, c, h, w)
            x_nhwc = jnp.transpose(imgs, (0, 2, 3, 1))  # -> NHWC for the kernels
            feats = []
            for (fused_blocks, params), full_net_name in zip(self.nets, self.full_net_names):
                mean, inv_std = self.norms[full_net_name]
                cur = normalize(x_nhwc, mean, inv_std)
                # torch.no_grad() for the 'real' prefix only affects autograd, not the numerics.
                net_feats = []
                p_it = iter(params)
                for ops in fused_blocks:
                    cur = self._run_block(cur, ops, p_it)
                    net_feats.append(jnp.transpose(cur.astype(jnp.float32), (0, 3, 1, 2)))
                feats.append(net_feats)
            data_dict[f'{prefix}_feats_ext'] = feats
        return data_dict


# ----------------------------------------------------------------------------- main
if __name__ == "__main__":
    key = jax.random.PRNGKey(0)
    k_real, k_fake, k_params = jax.random.split(key, 3)

    # small shapes consistent with the module: (b, t, c, h, w)
    b, t, c, h, w = 1, 2, 3, 32, 32
    real_imgs = jax.random.normal(k_real, (b, t, c, h, w), jnp.float32)
    fake_imgs = jax.random.normal(k_fake, (b, t, c, h, w), jnp.float32)

    data_dict = {'real_imgs': real_imgs, 'fake_imgs': fake_imgs}
    wrapper = NetworkWrapperPallas(k_params)

    out = wrapper.forward((data_dict, None))

    for prefix in ('real', 'fake'):
        for net_feats in out[f'{prefix}_feats_ext']:
            for feat in net_feats:
                jax.block_until_ready(feat)

    print("KERNEL_OK")
</pallas_src>

<mosaic_0001>
module attributes {stable_mosaic.version = 11 : i64} {
  func.func @_normalize_kernel(%arg0: i32, %arg1: i32, %arg2: memref<1x32x96xf32, #tpu.memory_space<vmem>>, %arg3: memref<1x1x96xf32, #tpu.memory_space<vmem>>, %arg4: memref<1x1x96xf32, #tpu.memory_space<vmem>>, %arg5: memref<1x32x96xbf16, #tpu.memory_space<vmem>>) attributes {dimension_semantics = [#tpu.dimension_semantics<parallel>, #tpu.dimension_semantics<parallel>], iteration_bounds = array<i64: 2, 1>, scalar_prefetch = 0 : i64, scratch_operands = 0 : i64, tpu.core_type = #tpu.core_type<tc>, window_params = [{transform_indices = @transform_0, window_bounds = array<i64: 1, 32, 96>}, {pipeline_mode = #tpu.pipeline_mode<synchronous>, transform_indices = @transform_1, window_bounds = array<i64: 1, 1, 96>}, {pipeline_mode = #tpu.pipeline_mode<synchronous>, transform_indices = @transform_2, window_bounds = array<i64: 1, 1, 96>}, {transform_indices = @transform_3, window_bounds = array<i64: 1, 32, 96>}]} {
    %c0 = arith.constant 0 : index
    %c0_0 = arith.constant 0 : index
    %c0_1 = arith.constant 0 : index
    %0 = vector.load %arg2[%c0, %c0_0, %c0_1] : memref<1x32x96xf32, #tpu.memory_space<vmem>>, vector<1x32x96xf32>
    %c0_2 = arith.constant 0 : index
    %c0_3 = arith.constant 0 : index
    %c0_4 = arith.constant 0 : index
    %1 = vector.load %arg3[%c0_2, %c0_3, %c0_4] : memref<1x1x96xf32, #tpu.memory_space<vmem>>, vector<1x1x96xf32>
    %2 = vector.broadcast %1 : vector<1x1x96xf32> to vector<1x32x96xf32>
    %3 = arith.subf %0, %2 : vector<1x32x96xf32>
    %c0_5 = arith.constant 0 : index
    %c0_6 = arith.constant 0 : index
    %c0_7 = arith.constant 0 : index
    %4 = vector.load %arg4[%c0_5, %c0_6, %c0_7] : memref<1x1x96xf32, #tpu.memory_space<vmem>>, vector<1x1x96xf32>
    %5 = vector.broadcast %4 : vector<1x1x96xf32> to vector<1x32x96xf32>
    %6 = arith.mulf %3, %5 : vector<1x32x96xf32>
    %7 = arith.truncf %6 : vector<1x32x96xf32> to vector<1x32x96xbf16>
    %c0_8 = arith.constant 0 : index
    %c0_9 = arith.constant 0 : index
    %c0_10 = arith.constant 0 : index
    %8 = vector.load %arg5[%c0_8, %c0_9, %c0_10] : memref<1x32x96xbf16, #tpu.memory_space<vmem>>, vector<1x32x96xbf16>
    tpu.vector_store %arg5[%c0_8, %c0_9, %c0_10], %7 {strides = array<i32>} : memref<1x32x96xbf16, #tpu.memory_space<vmem>>, vector<1x32x96xbf16>,
    return
  }
  func.func @transform_0(%arg0: i32, %arg1: i32) -> (i32, i32, i32) {
    %c0_i32 = arith.constant 0 : i32
    %c0_i32_0 = arith.constant 0 : i32
    return %arg0, %arg1, %c0_i32 : i32, i32, i32
  }
  func.func @transform_1(%arg0: i32, %arg1: i32) -> (i32, i32, i32) {
    %c0_i32 = arith.constant 0 : i32
    %c0_i32_0 = arith.constant 0 : i32
    %c0_i32_1 = arith.constant 0 : i32
    %c0_i32_2 = arith.constant 0 : i32
    return %c0_i32, %c0_i32_0, %c0_i32_1 : i32, i32, i32
  }
  func.func @transform_2(%arg0: i32, %arg1: i32) -> (i32, i32, i32) {
    %c0_i32 = arith.constant 0 : i32
    %c0_i32_0 = arith.constant 0 : i32
    %c0_i32_1 = arith.constant 0 : i32
    %c0_i32_2 = arith.constant 0 : i32
    return %c0_i32, %c0_i32_0, %c0_i32_1 : i32, i32, i32
  }
  func.func @transform_3(%arg0: i32, %arg1: i32) -> (i32, i32, i32) {
    %c0_i32 = arith.constant 0 : i32
    %c0_i32_0 = arith.constant 0 : i32
    return %arg0, %arg1, %c0_i32 : i32, i32, i32
  }
}

</mosaic_0001>

<bundles_post_ra>
// kernel: tile.14
= control target key start
LH: loop header
LB: loop body
LE: loop exit
PB: predicated region body
PF: predicated region fallthrough
CT: control target
= control target key end

     0   :  { %s259_s10 = smov 93   ;;  %s260_s11 = smov 87   ;;  %vm3_vm0 = vcmask 23552   ;;  %vm9_vm1 = vcmask 786152   ;;  %vm15_vm2 = vcmask 761552   ;;  %vm21_vm3 = vcmask 736952   ;;  %s399_s0 = inlined_call_operand.vmem [shape: f32[32,3], index: 0, kind: input, shape index: {}]   ;;  %s400_s1 = inlined_call_operand.vmem [shape: f32[1,1,96], index: 1, kind: output, shape index: {}]  }
   0x1   :  { %v197_v0 = vld [vmem:[%s399_s0 + $0x1f] sm:$0x1]   ;;  %v199_v1 = vld [vmem:[%s399_s0 + $0x1d] sm:$0x1]   ;;  %v198_v2 = vld [vmem:[%s399_s0 + $0x1e] sm:$0x1]  }
   0x2   :  { %7 = vrot.lane.b32.xlu0 %v197_v0, %s259_s10  ;;  %19 = vrot.lane.b32.xlu1 %v199_v1, %s260_s11  ;;  %v200_v3 = vld [vmem:[%s399_s0 + $0x1c] sm:$0x1]   ;;  %s261_s16 = smov 90   ;;  %s262_s17 = smov 84   ;;  %v201_v4 = vld [vmem:[%s399_s0 + $0x1b] sm:$0x1]  }
   0x3   :  { %v202_v5 = vld [vmem:[%s399_s0 + $0x1a] sm:$0x1]   ;;  %s263_s22 = smov 81   ;;  %s264_s23 = smov 78   ;;  %v203_v6 = vld [vmem:[%s399_s0 + $0x19] sm:$0x1]  }
   0x4   :  { %v204_v7 = vld [vmem:[%s399_s0 + $0x18] sm:$0x1]   ;;  %s265_s28 = smov 75   ;;  %s266_s29 = smov 72   ;;  %v205_v8 = vld [vmem:[%s399_s0 + $0x17] sm:$0x1]  }
   0x5   :  { %v206_v9 = vld [vmem:[%s399_s0 + $0x16] sm:$0x1]   ;;  %v2_v10 = vld [vmem:[%s399_s0] sm:$0x1]   ;;  %s267_s7 = smov 69   ;;  %s268_s8 = smov 66  }
   0x6   :  { %13 = vrot.lane.b32.xlu0 %v198_v2, %s261_s16  ;;  %25 = vrot.lane.b32.xlu1 %v200_v3, %s262_s17  ;;  %4 = vst.msk [vmem:[#allocation0] sm:$0x1] %vm3_vm0, %v2_v10   ;;  %v207_v11 = vld [vmem:[%s399_s0 + $0x15] sm:$0x1]   ;;  %v208_v12 = vld [vmem:[%s399_s0 + $0x14] sm:$0x1]  }
   0x7   :  { %s269_s13 = smov 63   ;;  %s270_s14 = smov 60   ;;  %v209_v13 = vld [vmem:[%s399_s0 + $0x13] sm:$0x1]   ;;  %v210_v14 = vld [vmem:[%s399_s0 + $0x12] sm:$0x1]  }
   0x8   :  { %s271_s19 = smov 57   ;;  %s272_s20 = smov 54   ;;  %v211_v15 = vld [vmem:[%s399_s0 + $0x11] sm:$0x1]   ;;  %v212_v16 = vld [vmem:[%s399_s0 + $0x10] sm:$0x1]  }
   0x9   :  { %s273_s25 = smov 51   ;;  %s274_s26 = smov 48   ;;  %v213_v17 = vld [vmem:[%s399_s0 + $0xf] sm:$0x1]   ;;  %v214_v18 = vld [vmem:[%s399_s0 + $0xe] sm:$0x1]  }
   0xa   :  { %31 = vrot.lane.b32.xlu0 %v201_v4, %s263_s22  ;;  %37 = vrot.lane.b32.xlu1 %v202_v5, %s264_s23  ;;  %s275_s2 = smov 45   ;;  %s276_s3 = smov 42   ;;  %v215_v19 = vld [vmem:[%s399_s0 + $0xd] sm:$0x1]   ;;  %v216_v20 = vld [vmem:[%s399_s0 + $0xc] sm:$0x1]  }
   0xb   :  { %s278_s9 = smov 36   ;;  %v217_v21 = vld [vmem:[%s399_s0 + $0xb] sm:$0x1]   ;;  %v218_v22 = vld [vmem:[%s399_s0 + $0xa] sm:$0x1]   ;;  %s280_s15 = smov 30  }
   0xc   :  { %v219_v23 = vld [vmem:[%s399_s0 + $0x9] sm:$0x1]   ;;  %v220_v24 = vld [vmem:[%s399_s0 + $0x8] sm:$0x1]   ;;  %s282_s21 = smov 24   ;;  %s284_s27 = smov 18  }
   0xd   :  { %v221_v25 = vld [vmem:[%s399_s0 + $0x7] sm:$0x1]   ;;  %v222_v26 = vld [vmem:[%s399_s0 + $0x6] sm:$0x1]   ;;  %v223_v27 = vld [vmem:[%s399_s0 + $0x5] sm:$0x1]  }
   0xe   :  { %43 = vrot.lane.b32.xlu0 %v203_v6, %s265_s28  ;;  %49 = vrot.lane.b32.xlu1 %v204_v7, %s266_s29  ;;  %v224_v28 = vld [vmem:[%s399_s0 + $0x4] sm:$0x1]   ;;  %s286_s4 = smov 12   ;;  %v225_v29 = vld [vmem:[%s399_s0 + $0x3] sm:$0x1]   ;;  %s288_s10 = smov 6  }
   0xf   :  { %v226_v30 = vld [vmem:[%s399_s0 + $0x2] sm:$0x1]   ;;  %v227_v31 = vld [vmem:[%s399_s0 + $0x1] sm:$0x1]   ;;  %s289_s0 = smov 3   ;;  %vm27_vm4 = vcmask 712352  }
  0x10   :  { %vm33_vm5 = vcmask 687752   ;;  %vm39_vm6 = vcmask 663152   ;;  %vm45_vm7 = vcmask 638552   ;;  %vm51_vm8 = vcmask 613952  }
  0x11   :  { %vm57_vm9 = vcmask 589352   ;;  %vm63_vm10 = vcmask 564752   ;;  %vm69_vm11 = vcmask 540152   ;;  %vm75_vm12 = vcmask 515552  }
  0x12   :  { %55 = vrot.lane.b32.xlu0 %v205_v8, %s267_s7  ;;  %61 = vrot.lane.b32.xlu1 %v206_v9, %s268_s8  ;;  %s277_s8 = smov 39   ;;  %vm81_vm13 = vcmask 490952   ;;  %vm87_vm14 = vcmask 466352   ;;  %vm93_vm15 = vcmask 441752   ;;  %vm99_vm0 = vcmask 417152  }
  0x16   :  { %67 = vrot.lane.b32.xlu0 %v207_v11, %s269_s13  ;;  %73 = vrot.lane.b32.xlu1 %v208_v12, %s270_s14  ;;  %s279_s14 = smov 33  }
  0x1a   :  { %79 = vrot.lane.b32.xlu0 %v209_v13, %s271_s19  ;;  %85 = vrot.lane.b32.xlu1 %v210_v14, %s272_s20  ;;  %s281_s20 = smov 27  }
  0x1e   :  { %91 = vrot.lane.b32.xlu0 %v211_v15, %s273_s25  ;;  %97 = vrot.lane.b32.xlu1 %v212_v16, %s274_s26  ;;  %s283_s26 = smov 21  }
  0x22   :  { %103 = vrot.lane.b32.xlu0 %v213_v17, %s275_s2  ;;  %109 = vrot.lane.b32.xlu1 %v214_v18, %s276_s3  ;;  %s285_s3 = smov 15  }
  0x26   :  { %115 = vrot.lane.b32.xlu0 %v215_v19, %s277_s8  ;;  %121 = vrot.lane.b32.xlu1 %v216_v20, %s278_s9  ;;  %s287_s9 = smov 9  }
  0x2a   :  { %127 = vrot.lane.b32.xlu0 %v217_v21, %s279_s14  ;;  %133 = vrot.lane.b32.xlu1 %v218_v22, %s280_s15 }
  0x2e   :  { %139 = vrot.lane.b32.xlu0 %v219_v23, %s281_s20  ;;  %145 = vrot.lane.b32.xlu1 %v220_v24, %s282_s21 }
  0x32   :  { %151 = vrot.lane.b32.xlu0 %v221_v25, %s283_s26  ;;  %157 = vrot.lane.b32.xlu1 %v222_v26, %s284_s27 }
  0x36   :  { %163 = vrot.lane.b32.xlu0 %v223_v27, %s285_s3  ;;  %169 = vrot.lane.b32.xlu1 %v224_v28, %s286_s4 }
  0x3a   :  { %175 = vrot.lane.b32.xlu0 %v225_v29, %s287_s9  ;;  %181 = vrot.lane.b32.xlu1 %v226_v30, %s288_s10 }
  0x3e   :  { %187 = vrot.lane.b32.xlu0 %v227_v31, %s289_s0 }
  0x74   :  { %v8_v32 = vpop.permute.xlu0 %7   ;;  %v20_v33 = vpop.permute.xlu1 %19  }
  0x75   :  { %10 = vst.msk [vmem:[#allocation0] sm:$0x1] %vm9_vm1, %v8_v32   ;;  %vm105_vm1 = vcmask 392552  }
  0x78   :  { %v14_v34 = vpop.permute.xlu0 %13   ;;  %v26_v35 = vpop.permute.xlu1 %25  }
  0x79   :  { %16 = vst.msk [vmem:[#allocation0] sm:$0x1] %vm15_vm2, %v14_v34   ;;  %vm111_vm2 = vcmask 367952  }
  0x7a   :  { %22 = vst.msk [vmem:[#allocation0] sm:$0x1] %vm21_vm3, %v20_v33   ;;  %vm117_vm3 = vcmask 343352  }
  0x7b   :  { %28 = vst.msk [vmem:[#allocation0] sm:$0x1] %vm27_vm4, %v26_v35   ;;  %vm123_vm4 = vcmask 318752  }
  0x7c   :  { %v32_v36 = vpop.permute.xlu0 %31   ;;  %v38_v37 = vpop.permute.xlu1 %37  }
  0x7d   :  { %34 = vst.msk [vmem:[#allocation0] sm:$0x1] %vm33_vm5, %v32_v36   ;;  %vm129_vm5 = vcmask 294152  }
  0x7e   :  { %40 = vst.msk [vmem:[#allocation0] sm:$0x1] %vm39_vm6, %v38_v37   ;;  %vm135_vm6 = vcmask 269552  }
  0x80   :  { %v44_v38 = vpop.permute.xlu0 %43   ;;  %v50_v39 = vpop.permute.xlu1 %49  }
  0x81   :  { %46 = vst.msk [vmem:[#allocation0] sm:$0x1] %vm45_vm7, %v44_v38   ;;  %vm141_vm7 = vcmask 244952  }
  0x82   :  { %52 = vst.msk [vmem:[#allocation0] sm:$0x1] %vm51_vm8, %v50_v39   ;;  %vm147_vm8 = vcmask 220352  }
  0x84   :  { %v56_v40 = vpop.permute.xlu0 %55   ;;  %v62_v41 = vpop.permute.xlu1 %61  }
  0x85   :  { %58 = vst.msk [vmem:[#allocation0] sm:$0x1] %vm57_vm9, %v56_v40   ;;  %vm153_vm9 = vcmask 195752  }
  0x86   :  { %64 = vst.msk [vmem:[#allocation0] sm:$0x1] %vm63_vm10, %v62_v41   ;;  %vm159_vm10 = vcmask 171152  }
  0x88   :  { %v68_v42 = vpop.permute.xlu0 %67   ;;  %v74_v43 = vpop.permute.xlu1 %73  }
  0x89   :  { %70 = vst.msk [vmem:[#allocation0] sm:$0x1] %vm69_vm11, %v68_v42   ;;  %vm165_vm11 = vcmask 146552  }
  0x8a   :  { %76 = vst.msk [vmem:[#allocation0] sm:$0x1] %vm75_vm12, %v74_v43   ;;  %vm171_vm12 = vcmask 121952  }
  0x8c   :  { %v80_v44 = vpop.permute.xlu0 %79   ;;  %v86_v45 = vpop.permute.xlu1 %85  }
  0x8d   :  { %82 = vst.msk [vmem:[#allocation0] sm:$0x1] %vm81_vm13, %v80_v44   ;;  %vm177_vm13 = vcmask 97352  }
  0x8e   :  { %88 = vst.msk [vmem:[#allocation0] sm:$0x1] %vm87_vm14, %v86_v45   ;;  %vm183_vm14 = vcmask 72752  }
  0x90   :  { %v92_v46 = vpop.permute.xlu0 %91   ;;  %v98_v47 = vpop.permute.xlu1 %97  }
  0x91   :  { %94 = vst.msk [vmem:[#allocation0] sm:$0x1] %vm93_vm15, %v92_v46   ;;  %vm189_vm15 = vcmask 48152  }
  0x92   :  { %100 = vst.msk [vmem:[#allocation0] sm:$0x1] %vm99_vm0, %v98_v47  }
  0x94   :  { %v104_v48 = vpop.permute.xlu0 %103   ;;  %v110_v49 = vpop.permute.xlu1 %109  }
  0x95   :  { %106 = vst.msk [vmem:[#allocation0] sm:$0x1] %vm105_vm1, %v104_v48  }
  0x96   :  { %112 = vst.msk [vmem:[#allocation0] sm:$0x1] %vm111_vm2, %v110_v49  }
  0x98   :  { %v116_v50 = vpop.permute.xlu0 %115   ;;  %v122_v51 = vpop.permute.xlu1 %121  }
  0x99   :  { %118 = vst.msk [vmem:[#allocation0] sm:$0x1] %vm117_vm3, %v116_v50  }
  0x9a   :  { %124 = vst.msk [vmem:[#allocation0] sm:$0x1] %vm123_vm4, %v122_v51  }
  0x9c   :  { %v128_v52 = vpop.permute.xlu0 %127   ;;  %v134_v53 = vpop.permute.xlu1 %133  }
  0x9d   :  { %130 = vst.msk [vmem:[#allocation0] sm:$0x1] %vm129_vm5, %v128_v52  }
  0x9e   :  { %136 = vst.msk [vmem:[#allocation0] sm:$0x1] %vm135_vm6, %v134_v53  }
  0xa0   :  { %v140_v54 = vpop.permute.xlu0 %139   ;;  %v146_v55 = vpop.permute.xlu1 %145  }
  0xa1   :  { %142 = vst.msk [vmem:[#allocation0] sm:$0x1] %vm141_vm7, %v140_v54  }
  0xa2   :  { %148 = vst.msk [vmem:[#allocation0] sm:$0x1] %vm147_vm8, %v146_v55  }
  0xa4   :  { %v152_v56 = vpop.permute.xlu0 %151   ;;  %v158_v57 = vpop.permute.xlu1 %157  }
  0xa5   :  { %154 = vst.msk [vmem:[#allocation0] sm:$0x1] %vm153_vm9, %v152_v56  }
  0xa6   :  { %160 = vst.msk [vmem:[#allocation0] sm:$0x1] %vm159_vm10, %v158_v57  }
  0xa8   :  { %v164_v58 = vpop.permute.xlu0 %163   ;;  %v170_v59 = vpop.permute.xlu1 %169  }
  0xa9   :  { %166 = vst.msk [vmem:[#allocation0] sm:$0x1] %vm165_vm11, %v164_v58  }
  0xaa   :  { %172 = vst.msk [vmem:[#allocation0] sm:$0x1] %vm171_vm12, %v170_v59  }
  0xac   :  { %v176_v60 = vpop.permute.xlu0 %175   ;;  %v182_v61 = vpop.permute.xlu1 %181  }
  0xad   :  { %178 = vst.msk [vmem:[#allocation0] sm:$0x1] %vm177_vm13, %v176_v60  }
  0xae   :  { %184 = vst.msk [vmem:[#allocation0] sm:$0x1] %vm183_vm14, %v182_v61  }
  0xb0   :  { %v188_v62 = vpop.permute.xlu0 %187  }
  0xb1   :  { %190 = vst.msk [vmem:[#allocation0] sm:$0x1] %vm189_vm15, %v188_v62  }
  0xb8   :  { %v194_v63 = vld [vmem:[#allocation0] sm:$0x1] }
  0xb9   :  { %196 = vst [vmem:[%s400_s1] sm:$0x1] %v194_v63 }

// kernel: tile.13
= control target key start
LH: loop header
LB: loop body
LE: loop exit
PB: predicated region body
PF: predicated region fallthrough
CT: control target
= control target key end

     0   :  { %s40_s0 = inlined_call_operand.vmem [shape: f32[3], index: 0, kind: input, shape index: {}]   ;;  %s41_s1 = inlined_call_operand.vmem [shape: f32[32,3], index: 1, kind: output, shape index: {}]  }
   0x1   :  { %v4_v0 = vld [vmem:[%s40_s0] ss:$0 sm:$0xff] }
   0x2   :  { %5 = vst [vmem:[%s41_s1] sm:$0xff] %v4_v0  ;;  %12 = vst [vmem:[%s41_s1 + $0x8] sm:$0xff] %v4_v0 }
   0x3   :  { %13 = vst [vmem:[%s41_s1 + $0x10] sm:$0xff] %v4_v0  ;;  %14 = vst [vmem:[%s41_s1 + $0x18] sm:$0xff] %v4_v0 }

// kernel: normalize.1
= control target key start
LH: loop header
LB: loop body
LE: loop exit
PB: predicated region body
PF: predicated region fallthrough
CT: control target
= control target key end

     0   :  { %s435_s12 = smov 0   ;;  %s437_s13 = smov 0   ;;  %s474_s0 = inlined_call_operand.vmem [shape: f32[2,32,96], index: 0, kind: input, shape index: {}]   ;;  %s475_s1 = inlined_call_operand.vmem [shape: f32[1,1,96], index: 1, kind: input, shape index: {}]   ;;  %s476_s2 = inlined_call_operand.vmem [shape: f32[1,1,96], index: 2, kind: input, shape index: {}]   ;;  %s477_s3 = inlined_call_operand.vmem [shape: bf16[2,32,96], index: 3, kind: output, shape index: {}]  }
   0x1   :  { %s439_s14 = smov 0  }
   0x2 LB: > { %s25_s15 = sadd.s32 1, %s409_s13  ;;  %p348_p0 = scmp.ge.s32.totalorder %s413_s14, 1  ;;  %s413_s14 = sphi %s439_s14, %s13_s14   ;;  %s409_s13 = sphi %s437_s13, %s479_s13   ;;  %s405_s12 = sphi %s435_s12, %s478_s12  }
   0x3   : > { %p27_p1 = scmp.ge.s32.totalorder %s25_s15, 2  ;;  %p158_p2 = scmp.lt.s32.totalorder %s413_s14, 3 }
   0x5   : > { %s481_s15 = smov (%p27_p1, %s25_s15), 0  ;;  %p159_p3 = pnand %p348_p0, %p158_p2 }
   0x6   : > { %p191_p4 = scmp.lt.s32.totalorder (!%p159_p3), %s405_s12, 1  ;;  %v353_v0 = vld [vmem:[%s475_s1] ss:$0 sm:$0xff] (!%p159_p3)  ;;  %vm252_vm0 = vcmask (!%p159_p3), 781312  }
   0x7   : > { %162 = sbr.rel (%p159_p3) target bundleno = 26 (0x1a), region = 32  ;;  %v354_v1 = vld [vmem:[%s476_s2] ss:$0 sm:$0xff] (!%p159_p3) }
   0xe   : > { %s483_s12 = smov (!%p191_p4, %s405_s12), 1 }
   0xf   : > { %s361_s16 = sshll.u32 %s483_s12, 5  ;;  %s362_s24 = sshll.u32 %s483_s12, 4 }
  0x10   : > { %s198_s21 = scalar_lea.vmem %s474_s0, %s361_s16  ;;  %s208_s27 = scalar_lea.vmem %s477_s3, %s362_s24 }
  0x11   : > { %v210_v2 = vld [vmem:[%s198_s21] sm:$0xff]  ;;  %v211_v3 = vld [vmem:[%s198_s21 + $0x8] sm:$0xff]  ;;  %v212_v4 = vld [vmem:[%s198_s21 + $0x10] sm:$0xff] }
  0x12   : > { %v221_v5 = vsub.f32 %v210_v2, %v353_v0  ;;  %v222_v6 = vsub.f32 %v211_v3, %v353_v0  ;;  %v223_v7 = vsub.f32 %v212_v4, %v353_v0  ;;  %v213_v8 = vld [vmem:[%s198_s21 + $0x18] sm:$0xff] }
  0x13   : > { %v224_v9 = vsub.f32 %v213_v8, %v353_v0 }
  0x14   : > { %v232_v10 = vmul.f32 %v354_v1, %v221_v5  ;;  %v233_v11 = vmul.f32 %v354_v1, %v222_v6  ;;  %v234_v12 = vmul.f32 %v354_v1, %v223_v7 }
  0x15   : > { %v235_v13 = vmul.f32 %v354_v1, %v224_v9 }
  0x16   : > { %v363_v14 = vpack.c.bf16 %v232_v10, %v232_v10  ;;  %v364_v15 = vpack.c.bf16 %v233_v11, %v233_v11  ;;  %v365_v16 = vpack.c.bf16 %v234_v12, %v234_v12 }
  0x17   : > { %v366_v17 = vpack.c.bf16 %v235_v13, %v235_v13 }
  0x18   : > { %253 = vst.msk [vmem:[%s208_s27] sm:$0xf] %vm252_vm0, %v363_v14  ;;  %254 = vst.msk [vmem:[%s208_s27 + $0x4] sm:$0xf] %vm252_vm0, %v364_v15 }
  0x19   : > { %255 = vst.msk [vmem:[%s208_s27 + $0x8] sm:$0xf] %vm252_vm0, %v365_v16  ;;  %256 = vst.msk [vmem:[%s208_s27 + $0xc] sm:$0xf] %vm252_vm0, %v366_v17 }
  0x1a PF: > { %s13_s14 = sadd.s32 1, %s413_s14   ;;  %s478_s12 = smov %s409_s13 }
  0x1b   : > { %p10_p5 = scmp.ge.s32.totalorder %s13_s14, 4   ;;  %s479_s13 = smov %s481_s15 }
  0x1d   :  { %12 = sbr.rel (!%p10_p5) target bundleno = 2 (0x2), region = 62 }

</bundles_post_ra>
